<compile_context>
chip_gen: v7x
topology: tpu7x:2x2x1
jax: 0.10.0
libtpu: 0.0.40
codegen_flags: <defaults>
</compile_context>

<pallas_src>
import math
import jax
import jax.numpy as jnp
from jax.experimental import pallas as pl
from jax.experimental.pallas import tpu as pltpu

EMBED_DIM = 32
N_HEADS = 8
HEAD_DIM = EMBED_DIM // N_HEADS
EXPANSION = 4
HIDDEN = EXPANSION * EMBED_DIM
LN_EPS = 1e-5          # nn.LayerNorm default
NEG_INF = -1e30        # large finite negative (NaN-safe additive mask)


def _layer_norm(y, gamma, beta):
    mean = jnp.mean(y, axis=-1, keepdims=True)
    var = jnp.mean((y - mean) ** 2, axis=-1, keepdims=True)   # biased, like PyTorch
    return (y - mean) * jax.lax.rsqrt(var + LN_EPS) * gamma + beta


def gpt_decoder_block_kernel(x_ref, mask_ref, hm_ref,
                             wqkv_ref, bqkv_ref, wo_ref, bo_ref, g0_ref, be0_ref,
                             w1_ref, b1_ref, w2_ref, b2_ref, g1_ref, be1_ref,
                             out_ref):
    bt, seq, emb = x_ref.shape
    n = bt * seq
    nh = N_HEADS

    # Flatten the batch tile to one (N, E) slab so every dense matmul runs as a
    # single contraction over E.
    x = x_ref[...].reshape(n, emb)                 # fp32: kept for residual / LN
    xb = x.astype(jnp.bfloat16)                    # bf16 MXU operand

    # ---- fused QKV projection: one (N,E)@(E,3E) matmul -----------------------
    qkv = jnp.dot(xb, wqkv_ref[...],
                  preferred_element_type=jnp.float32) + bqkv_ref[...]   # (N,3E) f32
    scale = jnp.float32(1.0 / math.sqrt(HEAD_DIM))
    q = (qkv[:, 0:emb] * scale).astype(jnp.bfloat16)                    # (N,E)
    k = qkv[:, emb:2 * emb].astype(jnp.bfloat16)                        # (N,E)
    v = qkv[:, 2 * emb:3 * emb].astype(jnp.bfloat16)                    # (N,E)

    # ---- attention via lane one-hot head masks (no reshapes / transposes) ----
    # hm[h, 0, e] == 1 iff lane e belongs to head h, so (q * hm_h) . k == q_h . k_h.
    hm = hm_ref[...]                                                    # (H,1,E) bf16
    qh = q[None, :, :] * hm                                             # (H,N,E)
    kb = jnp.broadcast_to(k[None, :, :], (nh, n, emb))                  # (H,N,E)
    vh = v[None, :, :] * hm                                             # (H,N,E)

    scores = jax.lax.dot_general(
        qh, kb, (((2,), (2,)), ((0,), (0,))),
        preferred_element_type=jnp.float32)                             # (H,N,N)
    scores = scores + mask_ref[...][None, :, :]
    m = jnp.max(scores, axis=-1, keepdims=True)
    p = jnp.exp(scores - m)
    denom = jnp.sum(p, axis=-1, keepdims=True)
    p = p * pl.reciprocal(denom, approx=True)                           # EUP, ~free

    # p @ v_masked: per-head results land on disjoint lanes, so summing over the
    # head axis IS the concat(heads) — no transpose / relayout needed.
    o = jax.lax.dot_general(
        p.astype(jnp.bfloat16), vh, (((2,), (1,)), ((0,), (0,))),
        preferred_element_type=jnp.float32)                             # (H,N,E)
    o = jnp.sum(o, axis=0)                                              # (N,E)

    att = jnp.dot(o.astype(jnp.bfloat16), wo_ref[...],
                  preferred_element_type=jnp.float32) + bo_ref[...]     # (N,E)

    # TODO(synk): Dropout(p=0.2) implemented as identity (eval-mode semantics).
    h0 = _layer_norm(att + x, g0_ref[...], be0_ref[...])

    f = jnp.dot(h0.astype(jnp.bfloat16), w1_ref[...],
                preferred_element_type=jnp.float32) + b1_ref[...]
    f = jnp.maximum(f, 0.0)
    f = jnp.dot(f.astype(jnp.bfloat16), w2_ref[...],
                preferred_element_type=jnp.float32) + b2_ref[...]

    out_ref[...] = _layer_norm(f + h0, g1_ref[...], be1_ref[...]).reshape(bt, seq, emb)


def _full_spec(shape):
    nd = len(shape)
    return pl.BlockSpec(shape, lambda b: (0,) * nd)


def _additive_mask(mask, batch_tile):
    """(S,S) nonzero==masked -> (batch_tile*S, batch_tile*S) fp32 additive mask.

    Block-diagonal so fused batch rows never attend across batch elements; uses a
    large finite negative instead of -inf (no NaN even for fully-masked rows).
    """
    s = mask.shape[-1]
    per = jnp.where(mask != 0, jnp.float32(NEG_INF), jnp.float32(0.0))
    if batch_tile == 1:
        return per
    eye = jnp.eye(batch_tile, dtype=jnp.float32)
    return (jnp.kron(eye, per)
            + jnp.kron((1.0 - eye) * jnp.float32(NEG_INF),
                       jnp.ones((s, s), jnp.float32)))


def gpt_decoder_block(x, mask, params, *, batch_tile=None):
    (wq, bq, wk, bk, wv, bv, wo, bo, g0, be0,
     w1, b1, w2, b2, g1, be1) = params
    B, S, E = x.shape
    assert E == EMBED_DIM

    if batch_tile is None:
        # Amortize the ~0.35us/step pipeline overhead by fusing batch rows, but
        # keep >= 2 "parallel" grid steps when possible for v7x's 2 TensorCores.
        batch_tile = B // 2 if (B >= 2 and B % 2 == 0) else B
    assert B % batch_tile == 0

    bf16 = jnp.bfloat16

    # Weights as bf16 MXU operands (fp32 accumulation in-kernel); biases and
    # LayerNorm params stay fp32.  QKV weights fused along the output axis.
    w_qkv = jnp.concatenate([wq, wk, wv], axis=1).astype(bf16)     # (E, 3E)
    b_qkv = jnp.concatenate([bq, bk, bv], axis=1)                  # (1, 3E) f32
    # Lane one-hot per head: hm[h, 0, e] = 1 iff e // HEAD_DIM == h.
    head_mask = ((jnp.arange(E) // HEAD_DIM)[None, None, :]
                 == jnp.arange(N_HEADS)[:, None, None]).astype(bf16)   # (H,1,E)
    mask_add = _additive_mask(mask, batch_tile)

    kparams = (w_qkv, b_qkv, wo.astype(bf16), bo, g0, be0,
               w1.astype(bf16), b1, w2.astype(bf16), b2, g1, be1)

    in_specs = [pl.BlockSpec((batch_tile, S, E), lambda b: (b, 0, 0)),
                _full_spec(mask_add.shape),
                _full_spec(head_mask.shape)]
    # Constant-index blocks: the pipeliner keeps them resident (no re-DMA when
    # the block index does not change between grid steps).
    in_specs += [_full_spec(p.shape) for p in kparams]

    return pl.pallas_call(
        gpt_decoder_block_kernel,
        out_shape=jax.ShapeDtypeStruct((B, S, E), jnp.float32),
        grid=(B // batch_tile,),
        in_specs=in_specs,
        out_specs=pl.BlockSpec((batch_tile, S, E), lambda b: (b, 0, 0)),
        compiler_params=pltpu.CompilerParams(dimension_semantics=("parallel",)),
    )(x, mask_add, head_mask, *kparams)


def init_params(key):
    ks = jax.random.split(key, 8)

    def lin(k, fan_in, fan_out):
        w = jax.random.normal(k, (fan_in, fan_out), jnp.float32) * 0.02
        b = jnp.zeros((1, fan_out), jnp.float32) + 0.01
        return w, b

    wq, bq = lin(ks[0], EMBED_DIM, EMBED_DIM)
    wk, bk = lin(ks[1], EMBED_DIM, EMBED_DIM)
    wv, bv = lin(ks[2], EMBED_DIM, EMBED_DIM)
    wo, bo = lin(ks[3], EMBED_DIM, EMBED_DIM)
    g0 = jnp.ones((1, EMBED_DIM), jnp.float32)
    be0 = jnp.zeros((1, EMBED_DIM), jnp.float32)
    w1, b1 = lin(ks[4], EMBED_DIM, HIDDEN)
    w2, b2 = lin(ks[5], HIDDEN, EMBED_DIM)
    g1 = jnp.ones((1, EMBED_DIM), jnp.float32)
    be1 = jnp.zeros((1, EMBED_DIM), jnp.float32)
    return (wq, bq, wk, bk, wv, bv, wo, bo, g0, be0,
            w1, b1, w2, b2, g1, be1)


def reference(x, mask, params):
    (wq, bq, wk, bk, wv, bv, wo, bo, g0, be0,
     w1, b1, w2, b2, g1, be1) = params

    def ln(y, g, b):
        m = jnp.mean(y, -1, keepdims=True)
        v = jnp.mean((y - m) ** 2, -1, keepdims=True)
        return (y - m) / jnp.sqrt(v + LN_EPS) * g + b

    B, S, E = x.shape
    q = x @ wq + bq
    k = x @ wk + bk
    v = x @ wv + bv
    qh = q.reshape(B, S, N_HEADS, HEAD_DIM).transpose(0, 2, 1, 3)
    kh = k.reshape(B, S, N_HEADS, HEAD_DIM).transpose(0, 2, 1, 3)
    vh = v.reshape(B, S, N_HEADS, HEAD_DIM).transpose(0, 2, 1, 3)
    s = (qh @ kh.transpose(0, 1, 3, 2)) / math.sqrt(HEAD_DIM)
    s = jnp.where(mask[None, None] != 0, -jnp.inf, s)
    p = jax.nn.softmax(s, axis=-1)
    o = (p @ vh).transpose(0, 2, 1, 3).reshape(B, S, E)
    att = o @ wo + bo
    h0 = ln(att + x, g0, be0)
    f = jnp.maximum(h0 @ w1 + b1, 0.0) @ w2 + b2
    return ln(f + h0, g1, be1)


if __name__ == "__main__":
    B, S = 2, 8
    key = jax.random.PRNGKey(0)
    kx, kp = jax.random.split(key)
    x = jax.random.normal(kx, (B, S, EMBED_DIM), jnp.float32)
    # causal mask: nonzero above the diagonal == masked future positions
    mask = jnp.triu(jnp.ones((S, S), jnp.int32), k=1)
    params = init_params(kp)

    out = jax.jit(gpt_decoder_block)(x, mask, params)
    out = jax.block_until_ready(out)

    ref = reference(x, mask, params)
    assert out.shape == (B, S, EMBED_DIM)
    err = float(jnp.max(jnp.abs(out - ref)))
    # bf16 MXU operands (fp32 accumulation) vs fp32 reference -> relaxed tolerance.
    assert jnp.allclose(out, ref, rtol=2e-2, atol=2e-2), f"max abs err {err}"
    print("KERNEL_OK")
</pallas_src>

<mosaic_0001>
module attributes {stable_mosaic.version = 11 : i64} {
  func.func @gpt_decoder_block_kernel(%arg0: i32, %arg1: memref<1x8x32xf32, #tpu.memory_space<vmem>>, %arg2: memref<8x8xf32, #tpu.memory_space<vmem>>, %arg3: memref<8x1x32xbf16, #tpu.memory_space<vmem>>, %arg4: memref<32x96xbf16, #tpu.memory_space<vmem>>, %arg5: memref<1x96xf32, #tpu.memory_space<vmem>>, %arg6: memref<32x32xbf16, #tpu.memory_space<vmem>>, %arg7: memref<1x32xf32, #tpu.memory_space<vmem>>, %arg8: memref<1x32xf32, #tpu.memory_space<vmem>>, %arg9: memref<1x32xf32, #tpu.memory_space<vmem>>, %arg10: memref<32x128xbf16, #tpu.memory_space<vmem>>, %arg11: memref<1x128xf32, #tpu.memory_space<vmem>>, %arg12: memref<128x32xbf16, #tpu.memory_space<vmem>>, %arg13: memref<1x32xf32, #tpu.memory_space<vmem>>, %arg14: memref<1x32xf32, #tpu.memory_space<vmem>>, %arg15: memref<1x32xf32, #tpu.memory_space<vmem>>, %arg16: memref<1x8x32xf32, #tpu.memory_space<vmem>>) attributes {dimension_semantics = [#tpu.dimension_semantics<parallel>], iteration_bounds = array<i64: 2>, scalar_prefetch = 0 : i64, scratch_operands = 0 : i64, tpu.core_type = #tpu.core_type<tc>, window_params = [{transform_indices = @transform_0, window_bounds = array<i64: 1, 8, 32>}, {pipeline_mode = #tpu.pipeline_mode<synchronous>, transform_indices = @transform_1, window_bounds = array<i64: 8, 8>}, {pipeline_mode = #tpu.pipeline_mode<synchronous>, transform_indices = @transform_2, window_bounds = array<i64: 8, 1, 32>}, {pipeline_mode = #tpu.pipeline_mode<synchronous>, transform_indices = @transform_3, window_bounds = array<i64: 32, 96>}, {pipeline_mode = #tpu.pipeline_mode<synchronous>, transform_indices = @transform_4, window_bounds = array<i64: 1, 96>}, {pipeline_mode = #tpu.pipeline_mode<synchronous>, transform_indices = @transform_5, window_bounds = array<i64: 32, 32>}, {pipeline_mode = #tpu.pipeline_mode<synchronous>, transform_indices = @transform_6, window_bounds = array<i64: 1, 32>}, {pipeline_mode = #tpu.pipeline_mode<synchronous>, transform_indices = @transform_7, window_bounds = array<i64: 1, 32>}, {pipeline_mode = #tpu.pipeline_mode<synchronous>, transform_indices = @transform_8, window_bounds = array<i64: 1, 32>}, {pipeline_mode = #tpu.pipeline_mode<synchronous>, transform_indices = @transform_9, window_bounds = array<i64: 32, 128>}, {pipeline_mode = #tpu.pipeline_mode<synchronous>, transform_indices = @transform_10, window_bounds = array<i64: 1, 128>}, {pipeline_mode = #tpu.pipeline_mode<synchronous>, transform_indices = @transform_11, window_bounds = array<i64: 128, 32>}, {pipeline_mode = #tpu.pipeline_mode<synchronous>, transform_indices = @transform_12, window_bounds = array<i64: 1, 32>}, {pipeline_mode = #tpu.pipeline_mode<synchronous>, transform_indices = @transform_13, window_bounds = array<i64: 1, 32>}, {pipeline_mode = #tpu.pipeline_mode<synchronous>, transform_indices = @transform_14, window_bounds = array<i64: 1, 32>}, {transform_indices = @transform_15, window_bounds = array<i64: 1, 8, 32>}]} {
    %c0 = arith.constant 0 : index
    %c0_0 = arith.constant 0 : index
    %c0_1 = arith.constant 0 : index
    %0 = vector.load %arg1[%c0, %c0_0, %c0_1] : memref<1x8x32xf32, #tpu.memory_space<vmem>>, vector<1x8x32xf32>
    %1 = vector.shape_cast %0 : vector<1x8x32xf32> to vector<8x32xf32>
    %2 = arith.truncf %1 : vector<8x32xf32> to vector<8x32xbf16>
    %c0_2 = arith.constant 0 : index
    %c0_3 = arith.constant 0 : index
    %3 = vector.load %arg4[%c0_2, %c0_3] : memref<32x96xbf16, #tpu.memory_space<vmem>>, vector<32x96xbf16>
    %cst = arith.constant dense<0.000000e+00> : vector<8x96xf32>
    %4 = tpu.matmul %2, %3, %cst {dimension_numbers = #tpu.dot_dimension_numbers<[1], [0], [0], [1], [0, 0, 1, 1], [], []>} : vector<8x32xbf16>, vector<32x96xbf16>, vector<8x96xf32> -> vector<8x96xf32>
    %c0_4 = arith.constant 0 : index
    %c0_5 = arith.constant 0 : index
    %5 = vector.load %arg5[%c0_4, %c0_5] : memref<1x96xf32, #tpu.memory_space<vmem>>, vector<1x96xf32>
    %6 = vector.broadcast %5 : vector<1x96xf32> to vector<8x96xf32>
    %7 = arith.addf %4, %6 : vector<8x96xf32>
    %8 = vector.extract_strided_slice %7 {offsets = [0, 0], sizes = [8, 32], strides = [1, 1]} : vector<8x96xf32> to vector<8x32xf32>
    %cst_6 = arith.constant 5.000000e-01 : f32
    %9 = vector.broadcast %cst_6 : f32 to vector<8x32xf32>
    %10 = arith.mulf %8, %9 : vector<8x32xf32>
    %11 = arith.truncf %10 : vector<8x32xf32> to vector<8x32xbf16>
    %12 = vector.extract_strided_slice %7 {offsets = [0, 32], sizes = [8, 32], strides = [1, 1]} : vector<8x96xf32> to vector<8x32xf32>
    %13 = arith.truncf %12 : vector<8x32xf32> to vector<8x32xbf16>
    %14 = vector.extract_strided_slice %7 {offsets = [0, 64], sizes = [8, 32], strides = [1, 1]} : vector<8x96xf32> to vector<8x32xf32>
    %15 = arith.truncf %14 : vector<8x32xf32> to vector<8x32xbf16>
    %c0_7 = arith.constant 0 : index
    %c0_8 = arith.constant 0 : index
    %c0_9 = arith.constant 0 : index
    %16 = vector.load %arg3[%c0_7, %c0_8, %c0_9] : memref<8x1x32xbf16, #tpu.memory_space<vmem>>, vector<8x1x32xbf16>
    %17 = vector.shape_cast %11 : vector<8x32xbf16> to vector<1x8x32xbf16>
    %18 = vector.broadcast %17 : vector<1x8x32xbf16> to vector<8x8x32xbf16>
    %19 = vector.broadcast %16 : vector<8x1x32xbf16> to vector<8x8x32xbf16>
    %20 = arith.mulf %18, %19 : vector<8x8x32xbf16>
    %21 = vector.shape_cast %13 : vector<8x32xbf16> to vector<1x8x32xbf16>
    %22 = vector.shape_cast %21 : vector<1x8x32xbf16> to vector<1x8x32xbf16>
    %23 = vector.broadcast %22 : vector<1x8x32xbf16> to vector<8x8x32xbf16>
    %24 = vector.shape_cast %15 : vector<8x32xbf16> to vector<1x8x32xbf16>
    %25 = vector.broadcast %24 : vector<1x8x32xbf16> to vector<8x8x32xbf16>
    %26 = vector.broadcast %16 : vector<8x1x32xbf16> to vector<8x8x32xbf16>
    %27 = arith.mulf %25, %26 : vector<8x8x32xbf16>
    %cst_10 = arith.constant dense<0.000000e+00> : vector<8x8x8xf32>
    %28 = tpu.matmul %20, %23, %cst_10 {dimension_numbers = #tpu.dot_dimension_numbers<[2], [2], [1], [1], [0, 0, 0, 1, 1, 1], [0], [0]>} : vector<8x8x32xbf16>, vector<8x8x32xbf16>, vector<8x8x8xf32> -> vector<8x8x8xf32>
    %c0_11 = arith.constant 0 : index
    %c0_12 = arith.constant 0 : index
    %29 = vector.load %arg2[%c0_11, %c0_12] : memref<8x8xf32, #tpu.memory_space<vmem>>, vector<8x8xf32>
    %30 = vector.shape_cast %29 : vector<8x8xf32> to vector<1x8x8xf32>
    %31 = vector.broadcast %30 : vector<1x8x8xf32> to vector<8x8x8xf32>
    %32 = arith.addf %28, %31 : vector<8x8x8xf32>
    %cst_13 = arith.constant dense<0xFF800000> : vector<8x8xf32>
    %33 = vector.multi_reduction <maximumf>, %32, %cst_13 [2] : vector<8x8x8xf32> to vector<8x8xf32>
    %34 = vector.shape_cast %33 : vector<8x8xf32> to vector<8x8x1xf32>
    %35 = vector.broadcast %34 : vector<8x8x1xf32> to vector<8x8x8xf32>
    %36 = arith.subf %32, %35 : vector<8x8x8xf32>
    %37 = math.exp %36 : vector<8x8x8xf32>
    %cst_14 = arith.constant dense<0.000000e+00> : vector<8x8xf32>
    %38 = vector.multi_reduction <add>, %37, %cst_14 [2] : vector<8x8x8xf32> to vector<8x8xf32>
    %39 = vector.shape_cast %38 : vector<8x8xf32> to vector<8x8x1xf32>
    %40 = tpu.reciprocal %39 {approx = true} : vector<8x8x1xf32> -> vector<8x8x1xf32>
    %41 = vector.broadcast %40 : vector<8x8x1xf32> to vector<8x8x8xf32>
    %42 = arith.mulf %37, %41 : vector<8x8x8xf32>
    %43 = arith.truncf %42 : vector<8x8x8xf32> to vector<8x8x8xbf16>
    %cst_15 = arith.constant dense<0.000000e+00> : vector<8x8x32xf32>
    %44 = tpu.matmul %43, %27, %cst_15 {dimension_numbers = #tpu.dot_dimension_numbers<[2], [1], [1], [2], [0, 0, 0, 1, 1, 2], [0], [0]>} : vector<8x8x8xbf16>, vector<8x8x32xbf16>, vector<8x8x32xf32> -> vector<8x8x32xf32>
    %cst_16 = arith.constant dense<0.000000e+00> : vector<8x32xf32>
    %45 = vector.multi_reduction <add>, %44, %cst_16 [0] : vector<8x8x32xf32> to vector<8x32xf32>
    %46 = arith.truncf %45 : vector<8x32xf32> to vector<8x32xbf16>
    %c0_17 = arith.constant 0 : index
    %c0_18 = arith.constant 0 : index
    %47 = vector.load %arg6[%c0_17, %c0_18] : memref<32x32xbf16, #tpu.memory_space<vmem>>, vector<32x32xbf16>
    %cst_19 = arith.constant dense<0.000000e+00> : vector<8x32xf32>
    %48 = tpu.matmul %46, %47, %cst_19 {dimension_numbers = #tpu.dot_dimension_numbers<[1], [0], [0], [1], [0, 0, 1, 1], [], []>} : vector<8x32xbf16>, vector<32x32xbf16>, vector<8x32xf32> -> vector<8x32xf32>
    %c0_20 = arith.constant 0 : index
    %c0_21 = arith.constant 0 : index
    %49 = vector.load %arg7[%c0_20, %c0_21] : memref<1x32xf32, #tpu.memory_space<vmem>>, vector<1x32xf32>
    %50 = vector.broadcast %49 : vector<1x32xf32> to vector<8x32xf32>
    %51 = arith.addf %48, %50 : vector<8x32xf32>
    %52 = arith.addf %51, %1 : vector<8x32xf32>
    %c0_22 = arith.constant 0 : index
    %c0_23 = arith.constant 0 : index
    %53 = vector.load %arg8[%c0_22, %c0_23] : memref<1x32xf32, #tpu.memory_space<vmem>>, vector<1x32xf32>
    %c0_24 = arith.constant 0 : index
    %c0_25 = arith.constant 0 : index
    %54 = vector.load %arg9[%c0_24, %c0_25] : memref<1x32xf32, #tpu.memory_space<vmem>>, vector<1x32xf32>
    %cst_26 = arith.constant dense<0.000000e+00> : vector<8xf32>
    %55 = vector.multi_reduction <add>, %52, %cst_26 [1] : vector<8x32xf32> to vector<8xf32>
    %56 = vector.shape_cast %55 : vector<8xf32> to vector<8x1xf32>
    %cst_27 = arith.constant 3.200000e+01 : f32
    %57 = vector.broadcast %cst_27 : f32 to vector<8x1xf32>
    %58 = arith.divf %56, %57 : vector<8x1xf32>
    %59 = vector.broadcast %58 : vector<8x1xf32> to vector<8x32xf32>
    %60 = arith.subf %52, %59 : vector<8x32xf32>
    %61 = arith.mulf %60, %60 : vector<8x32xf32>
    %cst_28 = arith.constant dense<0.000000e+00> : vector<8xf32>
    %62 = vector.multi_reduction <add>, %61, %cst_28 [1] : vector<8x32xf32> to vector<8xf32>
    %63 = vector.shape_cast %62 : vector<8xf32> to vector<8x1xf32>
    %cst_29 = arith.constant 3.200000e+01 : f32
    %64 = vector.broadcast %cst_29 : f32 to vector<8x1xf32>
    %65 = arith.divf %63, %64 : vector<8x1xf32>
    %66 = vector.broadcast %58 : vector<8x1xf32> to vector<8x32xf32>
    %67 = arith.subf %52, %66 : vector<8x32xf32>
    %cst_30 = arith.constant 9.99999974E-6 : f32
    %68 = vector.broadcast %cst_30 : f32 to vector<8x1xf32>
    %69 = arith.addf %65, %68 : vector<8x1xf32>
    %70 = math.rsqrt %69 : vector<8x1xf32>
    %71 = vector.broadcast %70 : vector<8x1xf32> to vector<8x32xf32>
    %72 = arith.mulf %67, %71 : vector<8x32xf32>
    %73 = vector.broadcast %53 : vector<1x32xf32> to vector<8x32xf32>
    %74 = arith.mulf %72, %73 : vector<8x32xf32>
    %75 = vector.broadcast %54 : vector<1x32xf32> to vector<8x32xf32>
    %76 = arith.addf %74, %75 : vector<8x32xf32>
    %77 = arith.truncf %76 : vector<8x32xf32> to vector<8x32xbf16>
    %c0_31 = arith.constant 0 : index
    %c0_32 = arith.constant 0 : index
    %78 = vector.load %arg10[%c0_31, %c0_32] : memref<32x128xbf16, #tpu.memory_space<vmem>>, vector<32x128xbf16>
    %cst_33 = arith.constant dense<0.000000e+00> : vector<8x128xf32>
    %79 = tpu.matmul %77, %78, %cst_33 {dimension_numbers = #tpu.dot_dimension_numbers<[1], [0], [0], [1], [0, 0, 1, 1], [], []>} : vector<8x32xbf16>, vector<32x128xbf16>, vector<8x128xf32> -> vector<8x128xf32>
    %c0_34 = arith.constant 0 : index
    %c0_35 = arith.constant 0 : index
    %80 = vector.load %arg11[%c0_34, %c0_35] : memref<1x128xf32, #tpu.memory_space<vmem>>, vector<1x128xf32>
    %81 = vector.broadcast %80 : vector<1x128xf32> to vector<8x128xf32>
    %82 = arith.addf %79, %81 : vector<8x128xf32>
    %cst_36 = arith.constant 0.000000e+00 : f32
    %83 = vector.broadcast %cst_36 : f32 to vector<8x128xf32>
    %84 = arith.maximumf %82, %83 : vector<8x128xf32>
    %85 = arith.truncf %84 : vector<8x128xf32> to vector<8x128xbf16>
    %c0_37 = arith.constant 0 : index
    %c0_38 = arith.constant 0 : index
    %86 = vector.load %arg12[%c0_37, %c0_38] : memref<128x32xbf16, #tpu.memory_space<vmem>>, vector<128x32xbf16>
    %cst_39 = arith.constant dense<0.000000e+00> : vector<8x32xf32>
    %87 = tpu.matmul %85, %86, %cst_39 {dimension_numbers = #tpu.dot_dimension_numbers<[1], [0], [0], [1], [0, 0, 1, 1], [], []>} : vector<8x128xbf16>, vector<128x32xbf16>, vector<8x32xf32> -> vector<8x32xf32>
    %c0_40 = arith.constant 0 : index
    %c0_41 = arith.constant 0 : index
    %88 = vector.load %arg13[%c0_40, %c0_41] : memref<1x32xf32, #tpu.memory_space<vmem>>, vector<1x32xf32>
    %89 = vector.broadcast %88 : vector<1x32xf32> to vector<8x32xf32>
    %90 = arith.addf %87, %89 : vector<8x32xf32>
    %91 = arith.addf %90, %76 : vector<8x32xf32>
    %c0_42 = arith.constant 0 : index
    %c0_43 = arith.constant 0 : index
    %92 = vector.load %arg14[%c0_42, %c0_43] : memref<1x32xf32, #tpu.memory_space<vmem>>, vector<1x32xf32>
    %c0_44 = arith.constant 0 : index
    %c0_45 = arith.constant 0 : index
    %93 = vector.load %arg15[%c0_44, %c0_45] : memref<1x32xf32, #tpu.memory_space<vmem>>, vector<1x32xf32>
    %cst_46 = arith.constant dense<0.000000e+00> : vector<8xf32>
    %94 = vector.multi_reduction <add>, %91, %cst_46 [1] : vector<8x32xf32> to vector<8xf32>
    %95 = vector.shape_cast %94 : vector<8xf32> to vector<8x1xf32>
    %cst_47 = arith.constant 3.200000e+01 : f32
    %96 = vector.broadcast %cst_47 : f32 to vector<8x1xf32>
    %97 = arith.divf %95, %96 : vector<8x1xf32>
    %98 = vector.broadcast %97 : vector<8x1xf32> to vector<8x32xf32>
    %99 = arith.subf %91, %98 : vector<8x32xf32>
    %100 = arith.mulf %99, %99 : vector<8x32xf32>
    %cst_48 = arith.constant dense<0.000000e+00> : vector<8xf32>
    %101 = vector.multi_reduction <add>, %100, %cst_48 [1] : vector<8x32xf32> to vector<8xf32>
    %102 = vector.shape_cast %101 : vector<8xf32> to vector<8x1xf32>
    %cst_49 = arith.constant 3.200000e+01 : f32
    %103 = vector.broadcast %cst_49 : f32 to vector<8x1xf32>
    %104 = arith.divf %102, %103 : vector<8x1xf32>
    %105 = vector.broadcast %97 : vector<8x1xf32> to vector<8x32xf32>
    %106 = arith.subf %91, %105 : vector<8x32xf32>
    %cst_50 = arith.constant 9.99999974E-6 : f32
    %107 = vector.broadcast %cst_50 : f32 to vector<8x1xf32>
    %108 = arith.addf %104, %107 : vector<8x1xf32>
    %109 = math.rsqrt %108 : vector<8x1xf32>
    %110 = vector.broadcast %109 : vector<8x1xf32> to vector<8x32xf32>
    %111 = arith.mulf %106, %110 : vector<8x32xf32>
    %112 = vector.broadcast %92 : vector<1x32xf32> to vector<8x32xf32>
    %113 = arith.mulf %111, %112 : vector<8x32xf32>
    %114 = vector.broadcast %93 : vector<1x32xf32> to vector<8x32xf32>
    %115 = arith.addf %113, %114 : vector<8x32xf32>
    %116 = vector.shape_cast %115 : vector<8x32xf32> to vector<1x8x32xf32>
    %c0_51 = arith.constant 0 : index
    %c0_52 = arith.constant 0 : index
    %c0_53 = arith.constant 0 : index
    %117 = vector.load %arg16[%c0_51, %c0_52, %c0_53] : memref<1x8x32xf32, #tpu.memory_space<vmem>>, vector<1x8x32xf32>
    tpu.vector_store %arg16[%c0_51, %c0_52, %c0_53], %116 {strides = array<i32>} : memref<1x8x32xf32, #tpu.memory_space<vmem>>, vector<1x8x32xf32>,
    return
  }
  func.func @transform_0(%arg0: i32) -> (i32, i32, i32) {
    %c0_i32 = arith.constant 0 : i32
    %c0_i32_0 = arith.constant 0 : i32
    %c0_i32_1 = arith.constant 0 : i32
    return %arg0, %c0_i32, %c0_i32_0 : i32, i32, i32
  }
  func.func @transform_1(%arg0: i32) -> (i32, i32) {
    %c0_i32 = arith.constant 0 : i32
    %c0_i32_0 = arith.constant 0 : i32
    %c0_i32_1 = arith.constant 0 : i32
    return %c0_i32, %c0_i32_0 : i32, i32
  }
  func.func @transform_2(%arg0: i32) -> (i32, i32, i32) {
    %c0_i32 = arith.constant 0 : i32
    %c0_i32_0 = arith.constant 0 : i32
    %c0_i32_1 = arith.constant 0 : i32
    %c0_i32_2 = arith.constant 0 : i32
    return %c0_i32, %c0_i32_0, %c0_i32_1 : i32, i32, i32
  }
  func.func @transform_3(%arg0: i32) -> (i32, i32) {
    %c0_i32 = arith.constant 0 : i32
    %c0_i32_0 = arith.constant 0 : i32
    %c0_i32_1 = arith.constant 0 : i32
    return %c0_i32, %c0_i32_0 : i32, i32
  }
  func.func @transform_4(%arg0: i32) -> (i32, i32) {
    %c0_i32 = arith.constant 0 : i32
    %c0_i32_0 = arith.constant 0 : i32
    %c0_i32_1 = arith.constant 0 : i32
    return %c0_i32, %c0_i32_0 : i32, i32
  }
  func.func @transform_5(%arg0: i32) -> (i32, i32) {
    %c0_i32 = arith.constant 0 : i32
    %c0_i32_0 = arith.constant 0 : i32
    %c0_i32_1 = arith.constant 0 : i32
    return %c0_i32, %c0_i32_0 : i32, i32
  }
  func.func @transform_6(%arg0: i32) -> (i32, i32) {
    %c0_i32 = arith.constant 0 : i32
    %c0_i32_0 = arith.constant 0 : i32
    %c0_i32_1 = arith.constant 0 : i32
    return %c0_i32, %c0_i32_0 : i32, i32
  }
  func.func @transform_7(%arg0: i32) -> (i32, i32) {
    %c0_i32 = arith.constant 0 : i32
    %c0_i32_0 = arith.constant 0 : i32
    %c0_i32_1 = arith.constant 0 : i32
    return %c0_i32, %c0_i32_0 : i32, i32
  }
  func.func @transform_8(%arg0: i32) -> (i32, i32) {
    %c0_i32 = arith.constant 0 : i32
    %c0_i32_0 = arith.constant 0 : i32
    %c0_i32_1 = arith.constant 0 : i32
    return %c0_i32, %c0_i32_0 : i32, i32
  }
  func.func @transform_9(%arg0: i32) -> (i32, i32) {
    %c0_i32 = arith.constant 0 : i32
    %c0_i32_0 = arith.constant 0 : i32
    %c0_i32_1 = arith.constant 0 : i32
    return %c0_i32, %c0_i32_0 : i32, i32
  }
  func.func @transform_10(%arg0: i32) -> (i32, i32) {
    %c0_i32 = arith.constant 0 : i32
    %c0_i32_0 = arith.constant 0 : i32
    %c0_i32_1 = arith.constant 0 : i32
    return %c0_i32, %c0_i32_0 : i32, i32
  }
  func.func @transform_11(%arg0: i32) -> (i32, i32) {
    %c0_i32 = arith.constant 0 : i32
    %c0_i32_0 = arith.constant 0 : i32
    %c0_i32_1 = arith.constant 0 : i32
    return %c0_i32, %c0_i32_0 : i32, i32
  }
  func.func @transform_12(%arg0: i32) -> (i32, i32) {
    %c0_i32 = arith.constant 0 : i32
    %c0_i32_0 = arith.constant 0 : i32
    %c0_i32_1 = arith.constant 0 : i32
    return %c0_i32, %c0_i32_0 : i32, i32
  }
  func.func @transform_13(%arg0: i32) -> (i32, i32) {
    %c0_i32 = arith.constant 0 : i32
    %c0_i32_0 = arith.constant 0 : i32
    %c0_i32_1 = arith.constant 0 : i32
    return %c0_i32, %c0_i32_0 : i32, i32
  }
  func.func @transform_14(%arg0: i32) -> (i32, i32) {
    %c0_i32 = arith.constant 0 : i32
    %c0_i32_0 = arith.constant 0 : i32
    %c0_i32_1 = arith.constant 0 : i32
    return %c0_i32, %c0_i32_0 : i32, i32
  }
  func.func @transform_15(%arg0: i32) -> (i32, i32, i32) {
    %c0_i32 = arith.constant 0 : i32
    %c0_i32_0 = arith.constant 0 : i32
    %c0_i32_1 = arith.constant 0 : i32
    return %arg0, %c0_i32, %c0_i32_0 : i32, i32, i32
  }
}

</mosaic_0001>

<bundles_post_ra>
// kernel: gpt_decoder_block.1
= control target key start
LH: loop header
LB: loop body
LE: loop exit
PB: predicated region body
PF: predicated region fallthrough
CT: control target
= control target key end

     0   :  { %s2823_s0 = inlined_call_operand.vmem [shape: f32[2,8,32], index: 0, kind: input, shape index: {}]   ;;  %s2824_s1 = inlined_call_operand.vmem [shape: f32[8,8], index: 1, kind: input, shape index: {}]   ;;  %s2825_s2 = inlined_call_operand.vmem [shape: bf16[8,1,32], index: 2, kind: input, shape index: {}]   ;;  %s2826_s3 = inlined_call_operand.vmem [shape: bf16[32,96], index: 3, kind: input, shape index: {}]   ;;  %s2827_s4 = inlined_call_operand.vmem [shape: f32[1,96], index: 4, kind: input, shape index: {}]   ;;  %s2828_s5 = inlined_call_operand.vmem [shape: bf16[32,32], index: 5, kind: input, shape index: {}]   ;;  %s2829_s6 = inlined_call_operand.vmem [shape: f32[1,32], index: 6, kind: input, shape index: {}]   ;;  %s2830_s7 = inlined_call_operand.vmem [shape: f32[1,32], index: 7, kind: input, shape index: {}]   ;;  %s2831_s8 = inlined_call_operand.vmem [shape: f32[1,32], index: 8, kind: input, shape index: {}]   ;;  %s2832_s9 = inlined_call_operand.vmem [shape: bf16[32,128], index: 9, kind: input, shape index: {}]   ;;  %s2833_s10 = inlined_call_operand.vmem [shape: f32[1,128], index: 10, kind: input, shape index: {}]   ;;  %s2834_s11 = inlined_call_operand.vmem [shape: bf16[128,32], index: 11, kind: input, shape index: {}]   ;;  %s2835_s12 = inlined_call_operand.vmem [shape: f32[1,32], index: 12, kind: input, shape index: {}]   ;;  %s2836_s13 = inlined_call_operand.vmem [shape: f32[1,32], index: 13, kind: input, shape index: {}]   ;;  %s2837_s14 = inlined_call_operand.vmem [shape: f32[1,32], index: 14, kind: input, shape index: {}]   ;;  %s2838_s15 = inlined_call_operand.hbm [shape: f32[2,8,32], index: 15, kind: output, shape index: {}]  }
   0x1   :  { %2842 = sst [smem:[#allocation8_spill]] %s2823_s0 }
   0x2   :  { %2843 = sst [smem:[#allocation9_spill]] %s2824_s1 }
   0x3   :  { %2844 = sst [smem:[#allocation10_spill]] %s2826_s3 }
   0x4   :  { %20 = vsyncpa [#allocation3], 0 }
   0x5   :  { %22 = vsyncpa [#allocation3 + $0x1], 0  ;;  %s2396_s18 = smov 0   ;;  %s2398_s19 = smov 0  }
   0x6   :  { %s2400_s20 = smov 0   ;;  %s2402_s21 = smov 0  }
   0x7 LB: > { %2845 = sst [smem:[#allocation5_spill]] %s2305_s20  ;;  %s2417_s22 = sadd.s32 4294967295, %s2309_s21   ;;  %s2309_s21 = sphi %s2402_s21, %s2853_s21   ;;  %s2305_s20 = sphi %s2400_s20, %s2855_s20   ;;  %s2301_s19 = sphi %s2398_s19, %s2857_s19   ;;  %s2297_s18 = sphi %s2396_s18, %s2856_s18  }
   0x8   : > { %s1913_s23 = sadd.s32 4294967294, %s2309_s21   ;;  %s2421_s24 = sadd.s32 1, %s2309_s21  }
   0x9   : > { %2846 = sst [smem:[#allocation6_spill]] %s2421_s24  ;;  %s355_s25 = sadd.s32 1, %s2305_s20 }
   0xa   : > { %s352_s26 = ssub.s32 %s2309_s21, %s2421_s24  ;;  %p365_p0 = scmp.ne.s32.totalorder %s2305_s20, %s2301_s19 }
   0xb   : > { %p353_p1 = scmp.eq.s32.totalorder %s352_s26, 0  ;;  %p366_p2 = scmp.eq.s32.totalorder %s2417_s22, 1 }
   0xc   : > { %p371_p3 = scmp.ne.s32.totalorder %s2301_s19, %s2297_s18  ;;  %p372_p4 = scmp.eq.s32.totalorder %s1913_s23, 1 }
   0xd   : > { %s2432_s27 = scalar_select %p353_p1, %s2305_s20, %s355_s25  }
   0xe   : > { %p2434_p5 = por %p366_p2, %p365_p0  ;;  %p2438_p6 = por %p372_p4, %p371_p3 }
   0xf   : > { %2847 = sst [smem:[#allocation7_spill]] %s2432_s27  ;;  %p1916_p7 = scmp.ge.s32.totalorder %s2309_s21, 1 }
  0x10   : > { %p439_p8 = scmp.lt.s32.totalorder %s2309_s21, 3 }
  0x12   : > { %p440_p9 = pnand %p1916_p7, %p439_p8 }
  0x13   : > { %s2850_s3 = sld [smem:[#allocation10_spill]] (!%p440_p9)  ;;  %v574_v1 = vlaneseq (!%p440_p9)  ;;  %v2311_v2 = vmov (!%p440_p9), 0.0   ;;  %vm2312_vm0 = vmmov (!%p440_p9), 0   ;;  %p486_p10 = scmp.lt.s32.totalorder (!%p440_p9), %s2417_s22, 1  ;;  %v563_v4 = vld [vmem:[%s2825_s2] sm:$0x1] (!%p440_p9) }
  0x14   : > { %443 = sbr.rel (%p440_p9) target bundleno = 2483 (0x9b3), region = 80  ;;  %2014 = vmatprep.subr.bf16.mxu0 (!%p440_p9), %v2311_v2  ;;  %2034 = vmatprep.subr.bf16.mxu1 (!%p440_p9), %v2311_v2  ;;  %v572_v6 = vpack.i.b16 (!%p440_p9), %v563_v4, %v563_v4  ;;  %v565_v7 = vld [vmem:[%s2825_s2 + $0x2] sm:$0x1] (!%p440_p9)  ;;  %v566_v10 = vld [vmem:[%s2825_s2 + $0x3] sm:$0x1] (!%p440_p9)  ;;  %s2851_s0 = sld [smem:[#allocation8_spill]] (!%p440_p9) }
  0x15   : > { %2018 = vmatprep.mubr.msk.bf16.mxu0 (!%p440_p9), %vm2312_vm0, %v2311_v2  ;;  %v575_v5 = vshrl.u32 (!%p440_p9), %v574_v1, 7  ;;  %2036 = vmatprep.mubr.msk.bf16.mxu1 (!%p440_p9), %vm2312_vm0, %v2311_v2  ;;  %v586_v9 = vpack.i.b16 (!%p440_p9), %v565_v7, %v565_v7  ;;  %v567_v12 = vld [vmem:[%s2825_s2 + $0x4] sm:$0x1] (!%p440_p9)  ;;  %vm516_vm1 = vcmask (!%p440_p9), 261120   ;;  %s2313_s24 = smov (!%p440_p9), 64   ;;  %v593_v15 = vpack.i.b16 (!%p440_p9), %v566_v10, %v566_v10  ;;  %s2852_s1 = sld [smem:[#allocation9_spill]] (!%p440_p9) }
  0x16   : > { %v600_v18 = vpack.i.b16 (!%p440_p9), %v567_v12, %v567_v12  ;;  %v569_v19 = vld [vmem:[%s2825_s2 + $0x6] sm:$0x1] (!%p440_p9)  ;;  %v564_v23 = vld [vmem:[%s2825_s2 + $0x1] sm:$0x1] (!%p440_p9)  ;;  %v568_v24 = vld [vmem:[%s2825_s2 + $0x5] sm:$0x1] (!%p440_p9) }
  0x17   : > { %v576_v8 = vsub.s32 (!%p440_p9), 0, %v575_v5  ;;  %v614_v21 = vpack.i.b16 (!%p440_p9), %v569_v19, %v569_v19  ;;  %v570_v25 = vld [vmem:[%s2825_s2 + $0x7] sm:$0x1] (!%p440_p9)  ;;  %v1919_v26 = vld [vmem:[%s2827_s4] ss:$0 sm:$0xff] (!%p440_p9)  ;;  %v579_v27 = vpack.i.b16 (!%p440_p9), %v564_v23, %v564_v23  ;;  %v607_v28 = vpack.i.b16 (!%p440_p9), %v568_v24, %v568_v24  ;;  %s483_s30 = sand.u32 (!%p440_p9), 1, %s2301_s19  }
  0x18   : > { %v621_v29 = vpack.i.b16 (!%p440_p9), %v570_v25, %v570_v25  ;;  %vm1129_vm2 = vcmask (!%p440_p9), 1043456   ;;  %vm1026_vm3 = vcmask (!%p440_p9), 64512   ;;  %s1917_s16 = sshll.u32 (!%p440_p9), %s483_s30, 3 }
  0x19   : > { %v2197_v0 = vld [vmem:[%s2850_s3] sm:$0xff] (!%p440_p9)   ;;  %v2198_v3 = vld [vmem:[%s2850_s3 + $0x8] sm:$0xff] (!%p440_p9)   ;;  %v2468_v11 = vrot.slane (!%p440_p9), %v572_v6, %v576_v8  ;;  %v591_v14 = vrot.slane (!%p440_p9), %v586_v9, %v576_v8  ;;  %v2485_v17 = vrot.slane (!%p440_p9), %v593_v15, %v576_v8  ;;  %v605_v20 = vrot.slane (!%p440_p9), %v600_v18, %v576_v8  ;;  %s485_s23 = scalar_lea.vmem (!%p440_p9), [#allocation2], %s1917_s16  ;;  %s1841_s3 = scalar_lea.sflag (!%p440_p9), [#allocation3], %s483_s30 }
  0x1a   : > { %2015 = vmatpush3.bf16.msra.mxu0 (!%p440_p9), %v2197_v0  ;;  %v2495_v22 = vrot.slane (!%p440_p9), %v614_v21, %v576_v8  ;;  %v584_v35 = vrot.slane (!%p440_p9), %v579_v27, %v576_v8  ;;  %v612_v39 = vrot.slane (!%p440_p9), %v607_v28, %v576_v8  ;;  %v626_v40 = vrot.slane (!%p440_p9), %v621_v29, %v576_v8 }
  0x1b   : > { %2016 = vmatprep.subr.bf16.mxu0 %v2311_v2  ;;  %s487_s17 = scalar_select %p486_p10, %s2417_s22, 1  ;;  %643 = vrot.lane.b32.xlu1 %v2468_v11, %s2313_s24  ;;  %v675_v60 = vld [vmem:[%s2852_s1] sm:$0xff] }
  0x1d   : > { %s1918_s25 = sshll.u32 %s487_s17, 3 }
  0x1e   : > { %2017 = vmatpush3.bf16.msra.mxu0 %v2198_v3  ;;  %s489_s20 = scalar_lea.vmem %s2851_s0, %s1918_s25  ;;  %s1854_s25 = sshll.u32 %s485_s23, 4  ;;  %s2782_s25 = int_to_ptr.vmem [resolvable:$true] %s1854_s25 }
  0x1f   : > { %2022 = vmatprep.subr.bf16.mxu0 %v2311_v2  ;;  %v2477_v13 = vld [vmem:[%s489_s20] sm:$0xff]  ;;  %647 = vrot.lane.b32.xlu1 %v591_v14, %s2313_s24  ;;  %s2314_s20 = smov 96  }
  0x20   : > { %v492_v16 = vpack.c.bf16 %v2477_v13, %v2477_v13 }
  0x22   : > { %2019 = vmatmul.mubr.msk.bf16.vlgmr.msra.gmra.mrb[0].mxu0 %vm516_vm1, %v492_v16 }
  0x23   : > { %2024 = vmatprep.mubr.msk.bf16.mxu0 %vm2312_vm0, %v2311_v2  ;;  %649 = vrot.lane.b32.xlu1 %v2485_v17, %s2313_s24 }
  0x27   : > { %651 = vrot.lane.b32.xlu1 %v605_v20, %s2313_s24 }
  0x2b   : > { %655 = vrot.lane.b32.xlu1 %v2495_v22, %s2313_s24 }
  0x8d   : > { %v644_v33 = vpop.permute.xlu1 %643 }
  0x91   : > { %v648_v46 = vpop.permute.xlu1 %647 }
  0x95   : > { %v2524_v50 = vpop.permute.xlu1 %649 }
  0x99   : > { %v2533_v53 = vpop.permute.xlu1 %651 }
  0x9d   : > { %v2539_v55 = vpop.permute.xlu1 %655 }
  0xf5   : > { %v554_v30 = vpop.f32.mrb[0].mxu0 }
  0xf6   : > { %v555_v31 = vadd.f32 %v1919_v26, %v554_v30  ;;  %v2020_v32 = vpop.f32.mrb[1].mxu0 }
  0xf7   : > { %v557_v34 = vpop.f32.mrb[2].mxu0 }
  0xf8   : > { %v560_v36 = vmul.f32 0.5, %v555_v31  ;;  %v2511_v37 = vpack.c.bf16 %v555_v31, %v555_v31  ;;  %v2021_v38 = vpop.f32.mrb[3].mxu0 }
  0xfa   : > { %v561_v41 = vpack.c.bf16 %v560_v36, %v560_v36  ;;  %677 = vrot.lane.b32.xlu0 %v2511_v37, %s2314_s20  ;;  %v667_v42 = vmul.bf16 %v644_v33, %v2511_v37  ;;  %v669_v47 = vmul.bf16 %v648_v46, %v2511_v37  ;;  %s2247_s20 = scalar_lea.vmem %s2782_s25, 128 }
  0xfb   : > { %p2248_p11 = scmp.ne.s32.totalorder %s2782_s25, %s2247_s20 }
  0xfc   : > { %1124 = vrot.lane.b32.xlu1 %v667_v42, %s2313_s24  ;;  %v628_v43 = vmul.bf16 %v584_v35, %v561_v41  ;;  %v632_v44 = vmul.bf16 %v612_v39, %v561_v41  ;;  %v634_v45 = vmul.bf16 %v626_v40, %v561_v41  ;;  %v627_v51 = vmul.bf16 %v2468_v11, %v561_v41 }
  0xfd   : > { %v629_v52 = vmul.bf16 %v591_v14, %v561_v41  ;;  %v631_v54 = vmul.bf16 %v605_v20, %v561_v41  ;;  %v630_v57 = vmul.bf16 %v2485_v17, %v561_v41  ;;  %v633_v58 = vmul.bf16 %v2495_v22, %v561_v41  ;;  %p2249_p12 = pnand %p2248_p11, %p2434_p5 }
  0xfe   : > { %645 = vrot.lane.b32.xlu0 %v584_v35, %s2313_s24 }
  0xff   : > { %p2250_p13 = pneg %p2249_p12 }
 0x100   : > { %1223 = vrot.lane.b32.xlu1 %v669_v47, %s2313_s24 }
 0x102   : > { %653 = vrot.lane.b32.xlu0 %v612_v39, %s2313_s24 }
 0x106   : > { %657 = vrot.lane.b32.xlu0 %v626_v40, %s2313_s24 }
 0x16c   : > { %v678_v48 = vpop.permute.xlu0 %677 }
 0x16d   : > { %v683_v49 = vsel %vm516_vm1, %v678_v48, 0 }
 0x16e   : > { %2023 = vmatpush3.bf16.xpose.msra.mxu0 %v683_v49  ;;  %2035 = vmatpush3.bf16.xpose.msra.mxu1 %v683_v49  ;;  %v1125_v56 = vpop.permute.xlu1 %1124 }
 0x16f   : > { %2028 = vmatprep.subr.bf16.mxu0 %v2311_v2  ;;  %2046 = vmatprep.subr.bf16.mxu1 %v2311_v2  ;;  %v1131_v59 = vsel %vm1129_vm2, %v1125_v56, 0 }
 0x170   : > { %v646_v34 = vpop.permute.xlu0 %645 }
 0x171   : > { %v668_v36 = vmul.bf16 %v646_v34, %v2511_v37 }
 0x175   : > { %2025 = vmatmul.mubr.msk.bf16.vlgmr.msra.gmra.mrb[4].mxu0 %vm516_vm1, %v627_v51  ;;  %2037 = vmatmul.mubr.msk.bf16.vlgmr.msra.gmra.mrb[0].mxu1 %vm516_vm1, %v629_v52  ;;  %v670_v51 = vmul.bf16 %v2524_v50, %v2511_v37  ;;  %v654_v52 = vpop.permute.xlu0 %653 }
 0x176   : > { %2029 = vmatpush3.bf16.xpose.msra.mxu0 %v683_v49  ;;  %2047 = vmatpush3.bf16.xpose.msra.mxu1 %v683_v49 }
 0x177   : > { %2030 = vmatprep.mubr.msk.bf16.mxu0 %vm2312_vm0, %v2311_v2  ;;  %2048 = vmatprep.mubr.msk.bf16.mxu1 %vm2312_vm0, %v2311_v2 }
 0x178   : > { %2040 = vmatprep.subr.bf16.mxu0 %v2311_v2  ;;  %2058 = vmatprep.subr.bf16.mxu1 %v2311_v2 }
 0x179   : > { %v2598_v56 = vpop.permute.xlu0 %657 }
 0x17d   : > { %2031 = vmatmul.mubr.msk.bf16.vlgmr.msra.gmra.mrb[8].mxu0 %vm516_vm1, %v628_v43  ;;  %2049 = vmatmul.mubr.msk.bf16.vlgmr.msra.gmra.mrb[4].mxu1 %vm516_vm1, %v631_v54  ;;  %v2596_v54 = vpop.permute.xlu1 %1223 }
 0x17e   : > { %2041 = vmatpush3.bf16.xpose.msra.mxu0 %v683_v49  ;;  %2059 = vmatpush3.bf16.xpose.msra.mxu1 %v683_v49 }
 0x17f   : > { %2042 = vmatprep.mubr.msk.bf16.mxu0 %vm2312_vm0, %v2311_v2  ;;  %2060 = vmatprep.mubr.msk.bf16.mxu1 %vm2312_vm0, %v2311_v2 }
 0x180   : > { %2052 = vmatprep.subr.bf16.mxu0 %v2311_v2  ;;  %2070 = vmatprep.subr.bf16.mxu1 %v2311_v2 }
 0x185   : > { %2043 = vmatmul.mubr.msk.bf16.vlgmr.msra.gmra.mrb[12].mxu0 %vm516_vm1, %v630_v57  ;;  %2061 = vmatmul.mubr.msk.bf16.vlgmr.msra.gmra.mrb[8].mxu1 %vm516_vm1, %v633_v58 }
 0x186   : > { %2053 = vmatpush3.bf16.xpose.msra.mxu0 %v683_v49  ;;  %2071 = vmatpush3.bf16.msra.mxu1 %v1131_v59 }
 0x187   : > { %2054 = vmatprep.mubr.msk.bf16.mxu0 %vm2312_vm0, %v2311_v2  ;;  %2064 = vmatprep.subr.bf16.mxu0 %v2311_v2 }
 0x188   : > { %2072 = vmatprep.mubr.msk.bf16.mxu1 %vm2312_vm0, %v2311_v2  ;;  %2082 = vmatprep.subr.bf16.mxu1 %v2311_v2 }
 0x18d   : > { %2055 = vmatmul.mubr.msk.bf16.vlgmr.msra.gmra.mrb[16].mxu0 %vm516_vm1, %v632_v44 }
 0x18e   : > { %2065 = vmatpush3.bf16.xpose.msra.mxu0 %v683_v49  ;;  %2066 = vmatprep.mubr.msk.bf16.mxu0 %vm2312_vm0, %v2311_v2 }
 0x18f   : > { %2076 = vmatprep.subr.bf16.mxu0 %v2311_v2 }
 0x195   : > { %2067 = vmatmul.mubr.msk.bf16.vlgmr.msra.gmra.mrb[20].mxu0 %vm516_vm1, %v634_v45 }
 0x196   : > { %2078 = vmatprep.mubr.msk.bf16.mxu0 %vm2312_vm0, %v2311_v2 }
 0x248   : > { %v719_v61 = vpop.f32.mrb[4].mxu0  ;;  %v805_v62 = vpop.f32.mrb[0].mxu1 }
 0x249   : > { %v2568_v63 = vadd.f32 %v719_v61, %v675_v60  ;;  %v2570_v0 = vadd.f32 %v805_v62, %v675_v60  ;;  %v2026_v1 = vpop.f32.mrb[5].mxu0  ;;  %v2038_v3 = vpop.f32.mrb[1].mxu1 }
 0x24a   : > { %v722_v4 = vpop.f32.mrb[6].mxu0  ;;  %v808_v5 = vpop.f32.mrb[2].mxu1 }
 0x24b   : > { %v2027_v6 = vpop.f32.mrb[7].mxu0  ;;  %v2039_v7 = vpop.f32.mrb[3].mxu1  ;;  %v1033_v8 = vsel %vm1026_vm3, %v2570_v0, -inf  ;;  %v1027_v9 = vsel %vm1026_vm3, %v2568_v63, -inf }
 0x24c   : > { %1034 = vmax.xlane.f32.xlu1 %v1033_v8  ;;  %1028 = vmax.xlane.f32.xlu0 %v1027_v9 }
 0x250   : > { %v762_v10 = vpop.f32.mrb[8].mxu0  ;;  %v891_v11 = vpop.f32.mrb[4].mxu1 }
 0x251   : > { %v763_v12 = vadd.f32 %v762_v10, %v675_v60  ;;  %v2032_v14 = vpop.f32.mrb[9].mxu0  ;;  %v2050_v15 = vpop.f32.mrb[5].mxu1  ;;  %v2576_v18 = vadd.f32 %v891_v11, %v675_v60  ;;  %v671_v11 = vmul.bf16 %v2533_v53, %v2511_v37 }
 0x252   : > { %v765_v16 = vpop.f32.mrb[10].mxu0  ;;  %v894_v17 = vpop.f32.mrb[6].mxu1  ;;  %v672_v15 = vmul.bf16 %v654_v52, %v2511_v37 }
 0x253   : > { %v2033_v19 = vpop.f32.mrb[11].mxu0  ;;  %v2051_v20 = vpop.f32.mrb[7].mxu1  ;;  %v1030_v21 = vsel %vm1026_vm3, %v763_v12, -inf  ;;  %v1039_v22 = vsel %vm1026_vm3, %v2576_v18, -inf }
 0x254   : > { %1031 = vmax.xlane.f32.xlu1 %v1030_v21 }
 0x258   : > { %v977_v23 = vpop.f32.mrb[8].mxu1  ;;  %1040 = vmax.xlane.f32.xlu1 %v1039_v22  ;;  %v848_v24 = vpop.f32.mrb[12].mxu0 }
 0x259   : > { %v2581_v25 = vadd.f32 %v848_v24, %v675_v60  ;;  %v2044_v26 = vpop.f32.mrb[13].mxu0  ;;  %v2062_v27 = vpop.f32.mrb[9].mxu1  ;;  %v2583_v30 = vadd.f32 %v977_v23, %v675_v60 }
 0x25a   : > { %v851_v28 = vpop.f32.mrb[14].mxu0  ;;  %v980_v29 = vpop.f32.mrb[10].mxu1 }
 0x25b   : > { %v2045_v31 = vpop.f32.mrb[15].mxu0  ;;  %v2063_v32 = vpop.f32.mrb[11].mxu1  ;;  %v1036_v33 = vsel %vm1026_vm3, %v2581_v25, -inf  ;;  %v1045_v35 = vsel %vm1026_vm3, %v2583_v30, -inf }
 0x25c   : > { %1037 = vmax.xlane.f32.xlu1 %v1036_v33 }
 0x260   : > { %1046 = vmax.xlane.f32.xlu1 %v1045_v35  ;;  %v934_v38 = vpop.f32.mrb[16].mxu0 }
 0x261   : > { %v935_v39 = vadd.f32 %v934_v38, %v675_v60  ;;  %v2056_v40 = vpop.f32.mrb[17].mxu0  ;;  %v673_v38 = vmul.bf16 %v2539_v55, %v2511_v37  ;;  %v1229_v55 = vsel %vm1129_vm2, %v2596_v54, 0 }
 0x262   : > { %1174 = vrot.lane.b32.xlu0 %v668_v36, %s2313_s24  ;;  %v937_v41 = vpop.f32.mrb[18].mxu0 }
 0x263   : > { %v2057_v42 = vpop.f32.mrb[19].mxu0  ;;  %v1042_v43 = vsel %vm1026_vm3, %v935_v39, -inf }
 0x264   : > { %1043 = vmax.xlane.f32.xlu1 %v1042_v43 }
 0x268   : > { %v1020_v44 = vpop.f32.mrb[20].mxu0 }
 0x269   : > { %v1021_v45 = vadd.f32 %v1020_v44, %v675_v60  ;;  %v2068_v46 = vpop.f32.mrb[21].mxu0 }
 0x26a   : > { %v1023_v47 = vpop.f32.mrb[22].mxu0 }
 0x26b   : > { %v2069_v48 = vpop.f32.mrb[23].mxu0  ;;  %v1048_v49 = vsel %vm1026_vm3, %v1021_v45, -inf }
 0x26c   : > { %1049 = vmax.xlane.f32.xlu1 %v1048_v49 }
 0x27d   : > { %1272 = vrot.lane.b32.xlu1 %v670_v51, %s2313_s24 }
 0x2d9   : > { %v1035_v57 = vpop.xlane.xlu1 %1034  ;;  %v1029_v58 = vpop.xlane.xlu0 %1028 }
 0x2da   : > { %v1053_v59 = vsub.f32 %v2570_v0, %v1035_v57  ;;  %v1051_v60 = vsub.f32 %v2568_v63, %v1029_v58 }
 0x2dc   : > { %v1063_v61 = vmul.f32 1.442695, %v1053_v59  ;;  %v1059_v62 = vmul.f32 1.442695, %v1051_v60 }
 0x2dd   : > { %v1175_v1 = vpop.permute.xlu0 %1174 }
 0x2de   : > { %2211 = vpow2.f32 %v1063_v61  ;;  %v1180_v3 = vsel %vm1129_vm2, %v1175_v1, 0 }
 0x2df   : > { %2213 = vpow2.f32 %v1059_v62  ;;  %2077 = vmatpush3.bf16.msra.mxu0 %v1180_v3 }
 0x2e0   : > { %2088 = vmatprep.subr.bf16.mxu0 %v2311_v2 }
 0x2e1   : > { %v1032_v50 = vpop.xlane.xlu1 %1031 }
 0x2e2   : > { %v1052_v4 = vsub.f32 %v763_v12, %v1032_v50 }
 0x2e4   : > { %v1061_v5 = vmul.f32 1.442695, %v1052_v4 }
 0x2e5   : > { %v1041_v10 = vpop.xlane.xlu1 %1040 }
 0x2e6   : > { %2215 = vpow2.f32 %v1061_v5  ;;  %v1055_v21 = vsub.f32 %v2576_v18, %v1041_v10 }
 0x2e8   : > { %v2604_v6 = vpop.eup %2211  ;;  %v1067_v23 = vmul.f32 1.442695, %v1055_v21 }
 0x2e9   : > { %v2214_v7 = vpop.eup %2213  ;;  %v1081_v63 = vsel %vm1026_vm3, %v2604_v6, 0.0  ;;  %v1038_v12 = vpop.xlane.xlu1 %1037 }
 0x2ea   : > { %1082 = vadd.xlane.f32.xlu0 %v1081_v63  ;;  %v1075_v0 = vsel %vm1026_vm3, %v2214_v7, 0.0  ;;  %v1054_v16 = vsub.f32 %v2581_v25, %v1038_v12 }
 0x2eb   : > { %1076 = vadd.xlane.f32.xlu1 %v1075_v0 }
 0x2ec   : > { %v1065_v19 = vmul.f32 1.442695, %v1054_v16 }
 0x2ed   : > { %v1047_v14 = vpop.xlane.xlu1 %1046 }
 0x2ee   : > { %2217 = vpow2.f32 %v1065_v19  ;;  %v1057_v53 = vsub.f32 %v2583_v30, %v1047_v14 }
 0x2f0   : > { %v2609_v8 = vpop.eup %2215  ;;  %v1071_v26 = vmul.f32 1.442695, %v1057_v53 }
 0x2f1   : > { %v1078_v9 = vsel %vm1026_vm3, %v2609_v8, 0.0  ;;  %v1044_v17 = vpop.xlane.xlu1 %1043 }
 0x2f2   : > { %1079 = vadd.xlane.f32.xlu0 %v1078_v9  ;;  %v1056_v20 = vsub.f32 %v935_v39, %v1044_v17  ;;  %v674_v39 = vmul.bf16 %v2598_v56, %v2511_v37 }
 0x2f4   : > { %v1069_v22 = vmul.f32 1.442695, %v1056_v20 }
 0x2f6   : > { %2219 = vpow2.f32 %v1069_v22  ;;  %v2199_v22 = vld [vmem:[%s2828_s5] sm:$0xff]  }
 0x2f7   : > { %2221 = vpow2.f32 %v1067_v23  ;;  %v2200_v23 = vld [vmem:[%s2828_s5 + $0x8] sm:$0xff]  }
 0x2f8   : > { %v2621_v28 = vpop.eup %2217  ;;  %2223 = vpow2.f32 %v1071_v26 }
 0x2f9   : > { %v1050_v24 = vpop.xlane.xlu1 %1049  ;;  %v1084_v25 = vsel %vm1026_vm3, %v2621_v28, 0.0 }
 0x2fa   : > { %v1058_v27 = vsub.f32 %v1021_v45, %v1050_v24 }
 0x2fc   : > { %1321 = vrot.lane.b32.xlu1 %v671_v11, %s2313_s24  ;;  %v1073_v29 = vmul.f32 1.442695, %v1058_v27 }
 0x2fd   : > { %v1273_v40 = vpop.permute.xlu1 %1272 }
 0x2fe   : > { %2225 = vpow2.f32 %v1073_v29  ;;  %v1278_v57 = vsel %vm1129_vm2, %v1273_v40, 0 }
 0x300   : > { %v2625_v31 = vpop.eup %2219 }
 0x301   : > { %v2627_v18 = vpop.eup %2221  ;;  %v1090_v30 = vsel %vm1026_vm3, %v2625_v31, 0.0 }
 0x302   : > { %v1087_v32 = vsel %vm1026_vm3, %v2627_v18, 0.0  ;;  %v2633_v33 = vpop.eup %2223 }
 0x303   : > { %v1093_v34 = vsel %vm1026_vm3, %v2633_v33, 0.0 }
 0x308   : > { %1370 = vrot.lane.b32.xlu0 %v672_v15, %s2313_s24  ;;  %v2637_v35 = vpop.eup %2225 }
 0x309   : > { %v1096_v36 = vsel %vm1026_vm3, %v2637_v35, 0.0 }
 0x320   : > { %1085 = vadd.xlane.f32.xlu1 %v1084_v25 }
 0x324   : > { %1091 = vadd.xlane.f32.xlu1 %v1090_v30 }
 0x327   : > { %1088 = vadd.xlane.f32.xlu0 %v1087_v32 }
 0x32b   : > { %1094 = vadd.xlane.f32.xlu0 %v1093_v34 }
 0x32f   : > { %1097 = vadd.xlane.f32.xlu0 %v1096_v36 }
 0x335   : > { %1419 = vrot.lane.b32.xlu1 %v673_v38, %s2313_s24 }
 0x345   : > { %1468 = vrot.lane.b32.xlu0 %v674_v39, %s2313_s24  ;;  %s1961_s24 = sshll.u32 %s2417_s22, 7  ;;  %s2315_s22 = smov [#allocation2]  }
 0x346   : > { %s2780_s1 = scalar_lea.hbm %s2838_s15, %s1961_s24  ;;  %s2251_s16 = sshll.u32 %s2315_s22, 4  ;;  %s2252_s16 = int_to_ptr.vmem [resolvable:$false] %s2251_s16 }
 0x347   : > { %s2253_s27 = scalar_lea.vmem %s2252_s16, 256  ;;  %p2254_p0 = scmp.lt.s32.totalorder %s2782_s25, %s2252_s16 }
 0x348   : > { %p2255_p1 = scmp.lt.s32.totalorder %s2253_s27, %s2247_s20 }
 0x34a   : > { %p2256_p2 = por %p2255_p1, %p2254_p0 }
 0x34c   : > { %p2257_p3 = pnand %p2256_p2, %p2250_p13 }
 0x377   : > { %v1083_v42 = vpop.xlane.xlu0 %1082 }
 0x378   : > { %v1077_v41 = vpop.xlane.xlu1 %1076 }
 0x379   : > { %2227 = vrcp.f32 %v1077_v41 }
 0x37a   : > { %2229 = vrcp.f32 %v1083_v42 }
 0x37c   : > { %v1322_v51 = vpop.permute.xlu1 %1321 }
 0x37d   : > { %v1327_v54 = vsel %vm1129_vm2, %v1322_v51, 0 }
 0x37f   : > { %v1080_v43 = vpop.xlane.xlu0 %1079 }
 0x380   : > { %2231 = vrcp.f32 %v1080_v43 }
 0x383   : > { %v2228_v44 = vpop.eup %2227  ;;  %v1371_v59 = vpop.permute.xlu0 %1370 }
 0x384   : > { %v1107_v45 = vmul.f32 %v2228_v44, %v2214_v7  ;;  %v2230_v47 = vpop.eup %2229 }
 0x385   : > { %v1109_v48 = vmul.f32 %v2230_v47, %v2604_v6  ;;  %v1376_v6 = vsel %vm1129_vm2, %v1371_v59, 0 }
 0x386   : > { %v1115_v46 = vpack.c.bf16 %v1107_v45, %v1107_v45 }
 0x387   : > { %v1117_v56 = vpack.c.bf16 %v1109_v48, %v1109_v48 }
 0x388   : > { %2073 = vmatmul.mubr.msk.bf16.vlgmr.msra.gmra.mrb[12].mxu1 %vm1026_vm3, %v1115_v46 }
 0x389   : > { %2083 = vmatpush3.bf16.msra.mxu1 %v1229_v55  ;;  %2084 = vmatprep.mubr.msk.bf16.mxu1 %vm2312_vm0, %v2311_v2 }
 0x38a   : > { %v2232_v37 = vpop.eup %2231  ;;  %2094 = vmatprep.subr.bf16.mxu1 %v2311_v2 }
 0x38b   : > { %v1108_v49 = vmul.f32 %v2232_v37, %v2609_v8 }
 0x38d   : > { %v1116_v52 = vpack.c.bf16 %v1108_v49, %v1108_v49 }
 0x38f   : > { %2079 = vmatmul.mubr.msk.bf16.vlgmr.msra.gmra.mrb[24].mxu0 %vm1026_vm3, %v1116_v52 }
 0x390   : > { %2085 = vmatmul.mubr.msk.bf16.vlgmr.msra.gmra.mrb[16].mxu1 %vm1026_vm3, %v1117_v56  ;;  %2089 = vmatpush3.bf16.msra.mxu0 %v1278_v57 }
 0x391   : > { %2095 = vmatpush3.bf16.msra.mxu1 %v1327_v54  ;;  %2090 = vmatprep.mubr.msk.bf16.mxu0 %vm2312_vm0, %v2311_v2 }
 0x392   : > { %2100 = vmatprep.subr.bf16.mxu0 %v2311_v2  ;;  %2096 = vmatprep.mubr.msk.bf16.mxu1 %vm2312_vm0, %v2311_v2 }
 0x393   : > { %2106 = vmatprep.subr.bf16.mxu1 %v2311_v2 }
 0x3ad   : > { %v1086_v58 = vpop.xlane.xlu1 %1085 }
 0x3ae   : > { %2233 = vrcp.f32 %v1086_v58 }
 0x3b1   : > { %v1092_v60 = vpop.xlane.xlu1 %1091 }
 0x3b2   : > { %2235 = vrcp.f32 %v1092_v60 }
 0x3b4   : > { %v1089_v61 = vpop.xlane.xlu0 %1088 }
 0x3b5   : > { %2237 = vrcp.f32 %v1089_v61  ;;  %v1420_v8 = vpop.permute.xlu1 %1419 }
 0x3b6   : > { %v1425_v14 = vsel %vm1129_vm2, %v1420_v8, 0  ;;  %v1939_v8 = vld [vmem:[%s2829_s6] ss:$0 sm:$0xff] }
 0x3b8   : > { %v2234_v62 = vpop.eup %2233  ;;  %v1095_v1 = vpop.xlane.xlu0 %1094 }
 0x3b9   : > { %v1110_v3 = vmul.f32 %v2234_v62, %v2621_v28  ;;  %2239 = vrcp.f32 %v1095_v1 }
 0x3bb   : > { %v1118_v50 = vpack.c.bf16 %v1110_v3, %v1110_v3 }
 0x3bc   : > { %v2236_v4 = vpop.eup %2235  ;;  %v1098_v5 = vpop.xlane.xlu0 %1097 }
 0x3bd   : > { %2241 = vrcp.f32 %v1098_v5  ;;  %2091 = vmatmul.mubr.msk.bf16.vlgmr.msra.gmra.mrb[28].mxu0 %vm1026_vm3, %v1118_v50  ;;  %v1112_v63 = vmul.f32 %v2236_v4, %v2625_v31 }
 0x3be   : > { %2101 = vmatpush3.bf16.msra.mxu0 %v1376_v6  ;;  %2102 = vmatprep.mubr.msk.bf16.mxu0 %vm2312_vm0, %v2311_v2 }
 0x3bf   : > { %v2238_v7 = vpop.eup %2237  ;;  %2112 = vmatprep.subr.bf16.mxu0 %v2311_v2  ;;  %v1120_v12 = vpack.c.bf16 %v1112_v63, %v1112_v63 }
 0x3c0   : > { %v1111_v0 = vmul.f32 %v2238_v7, %v2627_v18  ;;  %v1469_v9 = vpop.permute.xlu0 %1468 }
 0x3c1   : > { %v1474_v15 = vsel %vm1129_vm2, %v1469_v9, 0 }
 0x3c2   : > { %v1119_v10 = vpack.c.bf16 %v1111_v0, %v1111_v0 }
 0x3c3   : > { %v2240_v11 = vpop.eup %2239 }
 0x3c4   : > { %2097 = vmatmul.mubr.msk.bf16.vlgmr.msra.gmra.mrb[20].mxu1 %vm1026_vm3, %v1119_v10  ;;  %v1113_v16 = vmul.f32 %v2240_v11, %v2633_v33 }
 0x3c5   : > { %2103 = vmatmul.mubr.msk.bf16.vlgmr.msra.gmra.mrb[32].mxu0 %vm1026_vm3, %v1120_v12  ;;  %2107 = vmatpush3.bf16.msra.mxu1 %v1425_v14 }
 0x3c6   : > { %2113 = vmatpush3.bf16.msra.mxu0 %v1474_v15  ;;  %2108 = vmatprep.mubr.msk.bf16.mxu1 %vm2312_vm0, %v2311_v2  ;;  %v1121_v20 = vpack.c.bf16 %v1113_v16, %v1113_v16 }
 0x3c7   : > { %v2242_v17 = vpop.eup %2241  ;;  %2114 = vmatprep.mubr.msk.bf16.mxu0 %vm2312_vm0, %v2311_v2  ;;  %2118 = vmatprep.subr.bf16.mxu1 %v2311_v2 }
 0x3c8   : > { %v1114_v19 = vmul.f32 %v2242_v17, %v2637_v35  ;;  %2126 = vmatprep.subr.bf16.mxu0 %v2311_v2 }
 0x3ca   : > { %v1122_v21 = vpack.c.bf16 %v1114_v19, %v1114_v19 }
 0x3cc   : > { %2109 = vmatmul.mubr.msk.bf16.vlgmr.msra.gmra.mrb[24].mxu1 %vm1026_vm3, %v1121_v20 }
 0x3cd   : > { %2115 = vmatmul.mubr.msk.bf16.vlgmr.msra.gmra.mrb[36].mxu0 %vm1026_vm3, %v1122_v21  ;;  %2122 = vmatprep.mubr.msk.bf16.mxu1 %vm2312_vm0, %v2311_v2 }
 0x3ce   : > { %2130 = vmatprep.mubr.msk.bf16.mxu0 %vm2312_vm0, %v2311_v2  ;;  %2119 = vmatpush3.bf16.msra.mxu1 %v2199_v22 }
 0x3cf   : > { %2120 = vmatprep.subr.bf16.mxu1 %v2311_v2 }
 0x3d2   : > { %2121 = vmatpush3.bf16.msra.mxu1 %v2200_v23  ;;  %v2201_v23 = vld [vmem:[%s2832_s9] sm:$0xff]  }
 0x3d3   : > { %2134 = vmatprep.subr.bf16.mxu1 %v2311_v2  ;;  %2127 = vmatpush3.bf16.msra.mxu0 %v2201_v23 }
 0x3d4   : > { %2128 = vmatprep.subr.bf16.mxu0 %v2311_v2 }
 0x45b   : > { %v1167_v53 = vpop.f32.mrb[12].mxu1 }
 0x45c   : > { %v2074_v24 = vpop.f32.mrb[13].mxu1  ;;  %v1516_v29 = vsel %vm516_vm1, %v1167_v53, 0.0  ;;  %v2202_v53 = vld [vmem:[%s2832_s9 + $0x8] sm:$0xff]  }
 0x45d   : > { %v1170_v26 = vpop.f32.mrb[14].mxu1  ;;  %2129 = vmatpush3.bf16.msra.mxu0 %v2202_v53  ;;  %v2204_v24 = vld [vmem:[%s2834_s11 + $0x8] sm:$0xff]  }
 0x45e   : > { %v2075_v27 = vpop.f32.mrb[15].mxu1  ;;  %v2205_v26 = vld [vmem:[%s2834_s11 + $0x10] sm:$0xff]  }
 0x45f   : > { %v2206_v27 = vld [vmem:[%s2834_s11 + $0x18] sm:$0xff]  }
 0x462   : > { %v1216_v28 = vpop.f32.mrb[24].mxu0 }
 0x463   : > { %v1517_v25 = vsel %vm516_vm1, %v1216_v28, 0.0  ;;  %v1265_v31 = vpop.f32.mrb[16].mxu1  ;;  %v2080_v18 = vpop.f32.mrb[25].mxu0  ;;  %v2207_v28 = vld [vmem:[%s2834_s11 + $0x20] sm:$0xff]  }
 0x464   : > { %v1518_v30 = vadd.f32 %v1517_v25, %v1516_v29  ;;  %v2086_v32 = vpop.f32.mrb[17].mxu1  ;;  %v1219_v33 = vpop.f32.mrb[26].mxu0  ;;  %v1519_v34 = vsel %vm516_vm1, %v1265_v31, 0.0  ;;  %v2208_v29 = vld [vmem:[%s2834_s11 + $0x28] sm:$0xff]  }
 0x465   : > { %v1268_v35 = vpop.f32.mrb[18].mxu1  ;;  %v2081_v36 = vpop.f32.mrb[27].mxu0  ;;  %v1943_v32 = vld [vmem:[%s2830_s7] ss:$0 sm:$0xff] }
 0x466   : > { %v1520_v38 = vadd.f32 %v1519_v34, %v1518_v30  ;;  %v2087_v39 = vpop.f32.mrb[19].mxu1  ;;  %v1944_v34 = vld [vmem:[%s2831_s8] ss:$0 sm:$0xff] }
 0x467   : > { %v2209_v39 = vld [vmem:[%s2834_s11 + $0x30] sm:$0xff]  }
 0x490   : > { %v1314_v40 = vpop.f32.mrb[28].mxu0 }
 0x491   : > { %v1521_v41 = vsel %vm516_vm1, %v1314_v40, 0.0  ;;  %v2092_v42 = vpop.f32.mrb[29].mxu0  ;;  %v2210_v40 = vld [vmem:[%s2834_s11 + $0x38] sm:$0xff]  }
 0x492   : > { %v1522_v43 = vadd.f32 %v1521_v41, %v1520_v38  ;;  %v1317_v44 = vpop.f32.mrb[30].mxu0  ;;  %v1945_v41 = vld [vmem:[%s2833_s10] ss:$0 sm:$0xff] }
 0x493   : > { %v2093_v45 = vpop.f32.mrb[31].mxu0 }
 0x497   : > { %v1363_v46 = vpop.f32.mrb[20].mxu1 }
 0x498   : > { %v1523_v47 = vsel %vm516_vm1, %v1363_v46, 0.0  ;;  %v1412_v55 = vpop.f32.mrb[32].mxu0  ;;  %v2098_v37 = vpop.f32.mrb[21].mxu1 }
 0x499   : > { %v1524_v48 = vadd.f32 %v1523_v47, %v1522_v43  ;;  %v2104_v49 = vpop.f32.mrb[33].mxu0  ;;  %v1366_v51 = vpop.f32.mrb[22].mxu1  ;;  %v1525_v52 = vsel %vm516_vm1, %v1412_v55, 0.0 }
 0x49a   : > { %v1415_v56 = vpop.f32.mrb[34].mxu0  ;;  %v2099_v57 = vpop.f32.mrb[23].mxu1 }
 0x49b   : > { %v1526_v54 = vadd.f32 %v1525_v52, %v1524_v48  ;;  %v2105_v58 = vpop.f32.mrb[35].mxu0 }
 0x49f   : > { %v1461_v59 = vpop.f32.mrb[24].mxu1 }
 0x4a0   : > { %v1527_v60 = vsel %vm516_vm1, %v1461_v59, 0.0  ;;  %v1510_v61 = vpop.f32.mrb[36].mxu0  ;;  %v2110_v62 = vpop.f32.mrb[25].mxu1 }
 0x4a1   : > { %v1528_v1 = vadd.f32 %v1527_v60, %v1526_v54  ;;  %v2116_v3 = vpop.f32.mrb[37].mxu0  ;;  %v1464_v50 = vpop.f32.mrb[26].mxu1  ;;  %v1529_v4 = vsel %vm516_vm1, %v1510_v61, 0.0 }
 0x4a2   : > { %v1513_v5 = vpop.f32.mrb[38].mxu0  ;;  %v2111_v6 = vpop.f32.mrb[27].mxu1 }
 0x4a3   : > { %v1530_v7 = vadd.f32 %v1529_v4, %v1528_v1  ;;  %v2117_v63 = vpop.f32.mrb[39].mxu0  ;;  %v1958_v4 = vld [vmem:[%s2836_s13] ss:$0 sm:$0xff] }
 0x4a4   : > { %v1959_v6 = vld [vmem:[%s2837_s14] ss:$0 sm:$0xff] }
 0x4a5   : > { %v1531_v0 = vpack.c.bf16 %v1530_v7, %v1530_v7 }
 0x4a7   : > { %2123 = vmatmul.mubr.msk.bf16.vlgmr.msra.gmra.mrb[28].mxu1 %vm516_vm1, %v1531_v0 }
 0x4a8   : > { %2150 = vmatprep.mubr.msk.bf16.mxu1 %vm2312_vm0, %v2311_v2 }
 0x57a   : > { %v1592_v9 = vpop.f32.mrb[28].mxu1 }
 0x57b   : > { %v1593_v10 = vadd.f32 %v1939_v8, %v1592_v9  ;;  %v2124_v11 = vpop.f32.mrb[29].mxu1 }
 0x57c   : > { %v1595_v12 = vpop.f32.mrb[30].mxu1 }
 0x57d   : > { %v2125_v14 = vpop.f32.mrb[31].mxu1  ;;  %v1598_v15 = vadd.f32 %v1593_v10, %v2477_v13  ;;  %v2203_v13 = vld [vmem:[%s2834_s11] sm:$0xff]  }
 0x57e   : > { %2135 = vmatpush3.bf16.msra.mxu1 %v2203_v13 }
 0x57f   : > { %v1601_v16 = vsel %vm516_vm1, %v1598_v15, 0.0  ;;  %2136 = vmatprep.subr.bf16.mxu1 %v2311_v2 }
 0x580   : > { %1602 = vadd.xlane.f32.xlu1 %v1601_v16 }
 0x582   : > { %2137 = vmatpush3.bf16.msra.mxu1 %v2204_v24 }
 0x583   : > { %2138 = vmatprep.subr.bf16.mxu1 %v2311_v2 }
 0x586   : > { %2139 = vmatpush3.bf16.msra.mxu1 %v2205_v26 }
 0x587   : > { %2140 = vmatprep.subr.bf16.mxu1 %v2311_v2 }
 0x58a   : > { %2141 = vmatpush3.bf16.msra.mxu1 %v2206_v27 }
 0x58b   : > { %2142 = vmatprep.subr.bf16.mxu1 %v2311_v2 }
 0x58e   : > { %2143 = vmatpush3.bf16.msra.mxu1 %v2207_v28 }
 0x58f   : > { %2144 = vmatprep.subr.bf16.mxu1 %v2311_v2 }
 0x592   : > { %2145 = vmatpush3.bf16.msra.mxu1 %v2208_v29 }
 0x593   : > { %2146 = vmatprep.subr.bf16.mxu1 %v2311_v2 }
 0x596   : > { %2147 = vmatpush3.bf16.msra.mxu1 %v2209_v39 }
 0x597   : > { %2148 = vmatprep.subr.bf16.mxu1 %v2311_v2  ;;  %v1949_v2 = vld [vmem:[%s2835_s12] ss:$0 sm:$0xff] }
 0x59a   : > { %2149 = vmatpush3.bf16.msra.mxu1 %v2210_v40 }
 0x60d   : > { %v1603_v17 = vpop.xlane.xlu1 %1602 }
 0x60e   : > { %v1605_v19 = vmul.f32 0.03125, %v1603_v17 }
 0x610   : > { %v1606_v20 = vsub.f32 %v1598_v15, %v1605_v19 }
 0x612   : > { %v1607_v21 = vmul.f32 %v1606_v20, %v1606_v20 }
 0x614   : > { %v1608_v22 = vsel %vm516_vm1, %v1607_v21, 0.0 }
 0x615   : > { %1609 = vadd.xlane.f32.xlu0 %v1608_v22 }
 0x6a2   : > { %v1610_v25 = vpop.xlane.xlu0 %1609 }
 0x6a3   : > { %v1611_v31 = vmul.f32 0.03125, %v1610_v25 }
 0x6a5   : > { %v1612_v18 = vadd.f32 1e-05, %v1611_v31 }
 0x6a7   : > { %2243 = vrsqrt.f32 %v1612_v18 }
 0x6b1   : > { %v2244_v30 = vpop.eup %2243 }
 0x6b2   : > { %v1614_v33 = vmul.f32 %v2244_v30, %v1606_v20 }
 0x6b4   : > { %v1621_v35 = vmul.f32 %v1943_v32, %v1614_v33 }
 0x6b6   : > { %v1628_v36 = vadd.f32 %v1944_v34, %v1621_v35 }
 0x6b8   : > { %v1629_v38 = vpack.c.bf16 %v1628_v36, %v1628_v36 }
 0x6ba   : > { %2131 = vmatmul.mubr.msk.bf16.vlgmr.msra.gmra.mrb[40].mxu0 %vm516_vm1, %v1629_v38 }
 0x78d   : > { %v1690_v42 = vpop.f32.mrb[40].mxu0 }
 0x78e   : > { %v1691_v43 = vadd.f32 %v1945_v41, %v1690_v42  ;;  %v2132_v44 = vpop.f32.mrb[41].mxu0 }
 0x78f   : > { %v1693_v45 = vpop.f32.mrb[42].mxu0 }
 0x790   : > { %v1696_v46 = vmax.f32 %v1691_v43, 0.0  ;;  %v2133_v47 = vpop.f32.mrb[43].mxu0 }
 0x792   : > { %v1697_v55 = vpack.c.bf16 %v1696_v46, %v1696_v46 }
 0x794   : > { %2151 = vmatmul.mubr.bf16.vlgmr.msra.gmra.mrb[32].mxu1 %v1697_v55 }
 0x867   : > { %v1803_v37 = vpop.f32.mrb[32].mxu1 }
 0x868   : > { %v1804_v48 = vadd.f32 %v1949_v2, %v1803_v37  ;;  %v2152_v49 = vpop.f32.mrb[33].mxu1 }
 0x869   : > { %v1806_v51 = vpop.f32.mrb[34].mxu1 }
 0x86a   : > { %v2153_v52 = vpop.f32.mrb[35].mxu1  ;;  %v1809_v56 = vadd.f32 %v1804_v48, %v1628_v36 }
 0x86c   : > { %v1812_v57 = vsel %vm516_vm1, %v1809_v56, 0.0 }
 0x86d   : > { %1813 = vadd.xlane.f32.xlu0 %v1812_v57 }
 0x8fa   : > { %v1814_v54 = vpop.xlane.xlu0 %1813 }
 0x8fb   : > { %v1815_v58 = vmul.f32 0.03125, %v1814_v54 }
 0x8fd   : > { %v1816_v59 = vsub.f32 %v1809_v56, %v1815_v58 }
 0x8ff   : > { %v1817_v60 = vmul.f32 %v1816_v59, %v1816_v59 }
 0x901   : > { %v1818_v61 = vsel %vm516_vm1, %v1817_v60, 0.0 }
 0x902   : > { %1819 = vadd.xlane.f32.xlu1 %v1818_v61 }
 0x98f   : > { %v1820_v62 = vpop.xlane.xlu1 %1819 }
 0x990   : > { %v1821_v1 = vmul.f32 0.03125, %v1820_v62 }
 0x992   : > { %v1822_v3 = vadd.f32 1e-05, %v1821_v1 }
 0x994   : > { %2245 = vrsqrt.f32 %v1822_v3 }
 0x99e   : > { %v2246_v50 = vpop.eup %2245 }
 0x99f   : > { %v1824_v5 = vmul.f32 %v2246_v50, %v1816_v59 }
 0x9a1   : > { %v1831_v7 = vmul.f32 %v1958_v4, %v1824_v5 }
 0x9a3   : > { %v1838_v63 = vadd.f32 %v1959_v6, %v1831_v7 }
 0x9a5   : > { %1839 = vst.msk [vmem:[%s485_s23] sm:$0xff] %vm516_vm1, %v1838_v63 }
 0x9a6   : > { %2260 = shalt.err (!%p2257_p3)
}
 0x9a7   : > { %s2261_s0 = scalar_lea.hbm %s2780_s1, 128  ;;  %s2265_s24 = scalar_lea.hbm %s2838_s15, 256 }
 0x9a8   : > { %p2262_p4 = scmp.ne.s32.totalorder %s2780_s1, %s2261_s0  ;;  %p2266_p9 = scmp.lt.u32.totalorder %s2780_s1, %s2838_s15 }
 0x9a9   : > { %p2267_p10 = scmp.lt.u32.totalorder %s2265_s24, %s2261_s0  ;;  %p2269_p12 = scmp.lt.u32.totalorder %s2261_s0, %s2780_s1 }
 0x9aa   : > { %p2263_p7 = pnand %p2262_p4, %p2434_p5 }
 0x9ab   : > { %p2268_p11 = por %p2267_p10, %p2266_p9 }
 0x9ac   : > { %p2264_p8 = pneg %p2263_p7 }
 0x9ad   : > { %p2270_p13 = por %p2269_p12, %p2268_p11 }
 0x9af   : > { %p2271_p0 = pnand %p2270_p13, %p2264_p8 }
 0x9b1   : > { %2274 = shalt.err (!%p2271_p0)
}
 0x9b2   : > { %2154 = dma.vmem_to_hbm [thread:$0]  (%p2434_p5), %s2782_s25, 128, %s2780_s1, %s1841_s3  }
 0x9b3 PF: > { %p2160_p1 = scmp.ge.s32.totalorder %s2309_s21, 2  ;;  %s1866_s20 = sand.u32 1, %s2297_s18  }
 0x9b4   : > { %s1867_s22 = scalar_lea.sflag [#allocation3], %s1866_s20 }
 0x9b5   : > { %p2157_p2 = pnand %p2160_p1, %p2438_p6 }
 0x9b7   : > { %2292 = dma.done.wait (!%p2157_p2), %s1867_s22, 128  }
 0x9b8   : > { %2294 = vsyncadd (!%p2157_p2), %s1867_s22, 4294967168  ;;  %s2853_s21 = sld [smem:[#allocation6_spill]]  ;;  %s2854_s16 = sld [smem:[#allocation5_spill]] }
 0x9b9   : > { %s2855_s20 = sld [smem:[#allocation7_spill]]  ;;  %s2856_s18 = smov %s2301_s19 }
 0x9be   : > { %p25_p3 = scmp.ge.s32.totalorder %s2853_s21, 4   ;;  %s2857_s19 = smov %s2854_s16 }
 0x9c0   :  { %27 = sbr.rel (!%p25_p3) target bundleno = 7 (0x7), region = 115 }
 0x9c7   :  { %1872 = vsyncpa [#allocation3], 1 }
 0x9c8   :  { %1874 = vsyncpa [#allocation3 + $0x1], 1 }

</bundles_post_ra>
